<compile_context>
chip_gen: v7x
topology: tpu7x:2x2x1
jax: 0.10.0
libtpu: 0.0.40
codegen_flags: <defaults>
</compile_context>

<pallas_src>
import jax
import jax.numpy as jnp
from jax.experimental import pallas as pl
from jax.experimental.pallas import tpu as pltpu

LANE = 128


def _round_up(n, m):
    return ((n + m - 1) // m) * m


def mlp_kernel(x_ref, w1t_ref, b1_ref, scale_ref, shift_ref, wot_ref, bo_ref, o_ref):
    """One batch tile of the fused MLP forward.

    x_ref:     [TB, D]          input tile (bf16)
    w1t_ref:   [D, H_pad]       hidden Linear weight, transposed, lane-padded (bf16, resident)
    b1_ref:    [1, H_pad]       hidden Linear bias (f32, zero in padded lanes)
    scale_ref: [1, H_pad]       folded BN scale = gamma * rsqrt(rv + eps) (f32)
    shift_ref: [1, H_pad]       folded BN shift = beta - rm * scale       (f32)
    wot_ref:   [H_pad, C_pad]   output Linear weight, transposed, padded (bf16, resident)
    bo_ref:    [1, C_pad]       output Linear bias, lane-padded (f32)
    o_ref:     [TB, C_pad]      output logits tile (f32, lane-dense store)
    """
    x = x_ref[...]

    # --- hidden Linear: h = x @ W1^T + b1   (MXU bf16, f32 accumulate) ---
    h = jnp.dot(x, w1t_ref[...], preferred_element_type=jnp.float32) + b1_ref[...]
    h = jnp.maximum(h, 0.0)                       # self.actv after Linear

    # --- BatchNorm1d (eval) folded to scale/shift, then ReLU (idempotent chain) ---
    h = h * scale_ref[...] + shift_ref[...]
    h = jnp.maximum(h, 0.0)                       # actv / ReLU / Dropout(eval) / actv

    # --- output Linear: o = h @ Wout^T + bout   (MXU, lane-dense K and N) ---
    o_ref[...] = (
        jnp.dot(h.astype(wot_ref.dtype), wot_ref[...],
                preferred_element_type=jnp.float32) + bo_ref[...]
    ).astype(o_ref.dtype)


def _pick_batch_tile(B, sublane, block_batch):
    """Sublane-aligned batch tile; >=2 grid steps when the batch allows it."""
    if block_batch is not None:
        assert B % block_batch == 0, "block_batch must divide the batch"
        assert block_batch == B or block_batch % sublane == 0, (
            "block_batch must be a sublane multiple (or the whole batch)")
        return block_batch
    if B % sublane != 0 or B < 2 * sublane:
        return B                                   # too small to split cleanly
    tb = min(512, B // 2)
    tb = (tb // sublane) * sublane
    while B % tb != 0:                             # terminates at tb == sublane
        tb -= sublane
    return max(tb, sublane)


def mlp_forward(x, w1, b1, gamma, beta, rm, rv, w_out, b_out,
                *, eps=1e-5, block_batch=None, matmul_dtype=jnp.bfloat16):
    """Fused eval-mode MLP forward.

    Returns lane-padded logits of shape [B, C_pad] (C_pad = ceil(C/128)*128);
    columns C..C_pad-1 are exactly zero — slice in the consumer if needed.
    """
    B, D = x.shape
    H = w1.shape[0]
    C = w_out.shape[0]

    H_pad = _round_up(H, LANE)                     # lane-dense hidden width
    C_pad = _round_up(C, LANE)                     # lane-dense output width
    mm_bytes = jnp.dtype(matmul_dtype).itemsize

    # --- Glue: fold eval-mode BatchNorm into per-channel scale/shift (f32). ---
    scale = (gamma * jax.lax.rsqrt(rv + eps)).astype(jnp.float32)
    shift = (beta - rm * scale).astype(jnp.float32)

    # --- Glue: transpose, cast to MXU dtype, zero-pad H and C to lane width. ---
    w1t = jnp.zeros((D, H_pad), matmul_dtype).at[:, :H].set(w1.T.astype(matmul_dtype))
    b1p = jnp.zeros((1, H_pad), jnp.float32).at[:, :H].set(b1.astype(jnp.float32))
    scl = jnp.zeros((1, H_pad), jnp.float32).at[:, :H].set(scale)
    shf = jnp.zeros((1, H_pad), jnp.float32).at[:, :H].set(shift)
    wot = jnp.zeros((H_pad, C_pad), matmul_dtype).at[:H, :C].set(w_out.T.astype(matmul_dtype))
    bop = jnp.zeros((1, C_pad), jnp.float32).at[:, :C].set(b_out.astype(jnp.float32))
    x_mm = x.astype(matmul_dtype)

    # --- Batch tiling: sublane-aligned, >=2 steps when possible (v7x megacore). ---
    sublane = 16 if mm_bytes == 2 else 8
    TB = _pick_batch_tile(B, sublane, block_batch)
    grid = (B // TB,)
    const = lambda i: (0, 0)                       # params resident across tiles

    # --- VMEM budget (resident weights + double-buffered tiles + f32 h). ---
    resident = (D * H_pad + H_pad * C_pad) * mm_bytes + (3 * H_pad + C_pad) * 4
    per_tile = TB * D * mm_bytes + TB * C_pad * 4
    h_bytes = TB * H_pad * 4
    need = 2 * (resident + per_tile) + h_bytes + (4 << 20)
    cp_kwargs = {}
    if need > (32 << 20):
        cp_kwargs["vmem_limit_bytes"] = min(need, 64 << 20)

    cost = pl.CostEstimate(
        flops=2 * B * D * H_pad + 2 * B * H_pad * C_pad,
        transcendentals=0,
        bytes_accessed=(x_mm.size * mm_bytes + w1t.size * mm_bytes
                        + wot.size * mm_bytes + B * C_pad * 4),
    )

    out_pad = pl.pallas_call(
        mlp_kernel,
        out_shape=jax.ShapeDtypeStruct((B, C_pad), jnp.float32),
        grid_spec=pltpu.PrefetchScalarGridSpec(
            num_scalar_prefetch=0,
            grid=grid,
            in_specs=[
                pl.BlockSpec((TB, D), lambda i: (i, 0)),   # x: batch-tiled
                pl.BlockSpec((D, H_pad), const),           # W1^T   (resident)
                pl.BlockSpec((1, H_pad), const),           # b1
                pl.BlockSpec((1, H_pad), const),           # BN scale
                pl.BlockSpec((1, H_pad), const),           # BN shift
                pl.BlockSpec((H_pad, C_pad), const),       # Wout^T (resident)
                pl.BlockSpec((1, C_pad), const),           # bout
            ],
            out_specs=pl.BlockSpec((TB, C_pad), lambda i: (i, 0)),
        ),
        compiler_params=pltpu.CompilerParams(
            dimension_semantics=("parallel",), **cp_kwargs),
        cost_estimate=cost,
    )(x_mm, w1t, b1p, scl, shf, wot, bop)

    return out_pad                                 # [B, C_pad]; cols C.. are zero


if __name__ == "__main__":
    # Small shapes consistent with the module: D=32, H=32, C=10; batch 32 so
    # the default tiling yields a 2-step "parallel" grid (TB=16).
    B, D, H, C = 32, 32, 32, 10

    key = jax.random.PRNGKey(0)
    kx, kb1, kbo = jax.random.split(key, 3)

    x = jax.random.normal(kx, (B, D), dtype=jnp.float32)

    # initializer = torch.nn.init.ones_ -> weights are all ones.
    w1 = jnp.ones((H, D), dtype=jnp.float32)
    w_out = jnp.ones((C, H), dtype=jnp.float32)
    # Biases: PyTorch default Linear bias init, uniform(+-1/sqrt(fan_in)),
    # made deterministic via PRNGKey(0).
    b1 = jax.random.uniform(kb1, (H,), jnp.float32, -1.0 / D**0.5, 1.0 / D**0.5)
    b_out = jax.random.uniform(kbo, (C,), jnp.float32, -1.0 / H**0.5, 1.0 / H**0.5)
    # BatchNorm1d defaults (eval mode running stats).
    gamma = jnp.ones((H,), jnp.float32)
    beta = jnp.zeros((H,), jnp.float32)
    rm = jnp.zeros((H,), jnp.float32)
    rv = jnp.ones((H,), jnp.float32)

    out_pad = mlp_forward(x, w1, b1, gamma, beta, rm, rv, w_out, b_out)
    out_pad = jax.block_until_ready(out_pad)
    out = out_pad[:, :C]                           # consumer-side slice of padding

    # Pure-JAX reference with identical numerics: bf16 matmul inputs, f32
    # accumulation, f32 bias/BN/ReLU (redundant ReLUs are idempotent).
    xb = x.astype(jnp.bfloat16)
    w1b = w1.astype(jnp.bfloat16)
    wob = w_out.astype(jnp.bfloat16)
    scale = gamma * jax.lax.rsqrt(rv + 1e-5)
    shift = beta - rm * scale
    h = jnp.dot(xb, w1b.T, preferred_element_type=jnp.float32) + b1
    h = jnp.maximum(h, 0.0)
    h = jnp.maximum(h * scale + shift, 0.0)
    ref = jnp.dot(h.astype(jnp.bfloat16), wob.T,
                  preferred_element_type=jnp.float32) + b_out

    assert out.shape == (B, C)
    assert jnp.allclose(out_pad[:, C:], 0.0)                 # padding is inert
    assert jnp.allclose(out, ref, atol=1e-2, rtol=1e-3)

    print("KERNEL_OK")
</pallas_src>

<mosaic_0001>
module attributes {stable_mosaic.version = 11 : i64} {
  func.func @mlp_kernel(%arg0: i32, %arg1: memref<16x32xbf16, #tpu.memory_space<vmem>>, %arg2: memref<32x128xbf16, #tpu.memory_space<vmem>>, %arg3: memref<1x128xf32, #tpu.memory_space<vmem>>, %arg4: memref<1x128xf32, #tpu.memory_space<vmem>>, %arg5: memref<1x128xf32, #tpu.memory_space<vmem>>, %arg6: memref<128x128xbf16, #tpu.memory_space<vmem>>, %arg7: memref<1x128xf32, #tpu.memory_space<vmem>>, %arg8: memref<16x128xf32, #tpu.memory_space<vmem>>) attributes {dimension_semantics = [#tpu.dimension_semantics<parallel>], iteration_bounds = array<i64: 2>, scalar_prefetch = 0 : i64, scratch_operands = 0 : i64, tpu.core_type = #tpu.core_type<tc>, window_params = [{transform_indices = @transform_0, window_bounds = array<i64: 16, 32>}, {pipeline_mode = #tpu.pipeline_mode<synchronous>, transform_indices = @transform_1, window_bounds = array<i64: 32, 128>}, {pipeline_mode = #tpu.pipeline_mode<synchronous>, transform_indices = @transform_2, window_bounds = array<i64: 1, 128>}, {pipeline_mode = #tpu.pipeline_mode<synchronous>, transform_indices = @transform_3, window_bounds = array<i64: 1, 128>}, {pipeline_mode = #tpu.pipeline_mode<synchronous>, transform_indices = @transform_4, window_bounds = array<i64: 1, 128>}, {pipeline_mode = #tpu.pipeline_mode<synchronous>, transform_indices = @transform_5, window_bounds = array<i64: 128, 128>}, {pipeline_mode = #tpu.pipeline_mode<synchronous>, transform_indices = @transform_6, window_bounds = array<i64: 1, 128>}, {transform_indices = @transform_7, window_bounds = array<i64: 16, 128>}]} {
    %c0 = arith.constant 0 : index
    %c0_0 = arith.constant 0 : index
    %0 = vector.load %arg1[%c0, %c0_0] : memref<16x32xbf16, #tpu.memory_space<vmem>>, vector<16x32xbf16>
    %c0_1 = arith.constant 0 : index
    %c0_2 = arith.constant 0 : index
    %1 = vector.load %arg2[%c0_1, %c0_2] : memref<32x128xbf16, #tpu.memory_space<vmem>>, vector<32x128xbf16>
    %cst = arith.constant dense<0.000000e+00> : vector<16x128xf32>
    %2 = tpu.matmul %0, %1, %cst {dimension_numbers = #tpu.dot_dimension_numbers<[1], [0], [0], [1], [0, 0, 1, 1], [], []>} : vector<16x32xbf16>, vector<32x128xbf16>, vector<16x128xf32> -> vector<16x128xf32>
    %c0_3 = arith.constant 0 : index
    %c0_4 = arith.constant 0 : index
    %3 = vector.load %arg3[%c0_3, %c0_4] : memref<1x128xf32, #tpu.memory_space<vmem>>, vector<1x128xf32>
    %4 = vector.broadcast %3 : vector<1x128xf32> to vector<16x128xf32>
    %5 = arith.addf %2, %4 : vector<16x128xf32>
    %cst_5 = arith.constant 0.000000e+00 : f32
    %6 = vector.broadcast %cst_5 : f32 to vector<16x128xf32>
    %7 = arith.maximumf %5, %6 : vector<16x128xf32>
    %c0_6 = arith.constant 0 : index
    %c0_7 = arith.constant 0 : index
    %8 = vector.load %arg4[%c0_6, %c0_7] : memref<1x128xf32, #tpu.memory_space<vmem>>, vector<1x128xf32>
    %9 = vector.broadcast %8 : vector<1x128xf32> to vector<16x128xf32>
    %10 = arith.mulf %7, %9 : vector<16x128xf32>
    %c0_8 = arith.constant 0 : index
    %c0_9 = arith.constant 0 : index
    %11 = vector.load %arg5[%c0_8, %c0_9] : memref<1x128xf32, #tpu.memory_space<vmem>>, vector<1x128xf32>
    %12 = vector.broadcast %11 : vector<1x128xf32> to vector<16x128xf32>
    %13 = arith.addf %10, %12 : vector<16x128xf32>
    %cst_10 = arith.constant 0.000000e+00 : f32
    %14 = vector.broadcast %cst_10 : f32 to vector<16x128xf32>
    %15 = arith.maximumf %13, %14 : vector<16x128xf32>
    %16 = arith.truncf %15 : vector<16x128xf32> to vector<16x128xbf16>
    %c0_11 = arith.constant 0 : index
    %c0_12 = arith.constant 0 : index
    %17 = vector.load %arg6[%c0_11, %c0_12] : memref<128x128xbf16, #tpu.memory_space<vmem>>, vector<128x128xbf16>
    %cst_13 = arith.constant dense<0.000000e+00> : vector<16x128xf32>
    %18 = tpu.matmul %16, %17, %cst_13 {dimension_numbers = #tpu.dot_dimension_numbers<[1], [0], [0], [1], [0, 0, 1, 1], [], []>} : vector<16x128xbf16>, vector<128x128xbf16>, vector<16x128xf32> -> vector<16x128xf32>
    %c0_14 = arith.constant 0 : index
    %c0_15 = arith.constant 0 : index
    %19 = vector.load %arg7[%c0_14, %c0_15] : memref<1x128xf32, #tpu.memory_space<vmem>>, vector<1x128xf32>
    %20 = vector.broadcast %19 : vector<1x128xf32> to vector<16x128xf32>
    %21 = arith.addf %18, %20 : vector<16x128xf32>
    %c0_16 = arith.constant 0 : index
    %c0_17 = arith.constant 0 : index
    %22 = vector.load %arg8[%c0_16, %c0_17] : memref<16x128xf32, #tpu.memory_space<vmem>>, vector<16x128xf32>
    tpu.vector_store %arg8[%c0_16, %c0_17], %21 {strides = array<i32>} : memref<16x128xf32, #tpu.memory_space<vmem>>, vector<16x128xf32>,
    return
  }
  func.func @transform_0(%arg0: i32) -> (i32, i32) {
    %c0_i32 = arith.constant 0 : i32
    %c0_i32_0 = arith.constant 0 : i32
    return %arg0, %c0_i32 : i32, i32
  }
  func.func @transform_1(%arg0: i32) -> (i32, i32) {
    %c0_i32 = arith.constant 0 : i32
    %c0_i32_0 = arith.constant 0 : i32
    %c0_i32_1 = arith.constant 0 : i32
    return %c0_i32, %c0_i32_0 : i32, i32
  }
  func.func @transform_2(%arg0: i32) -> (i32, i32) {
    %c0_i32 = arith.constant 0 : i32
    %c0_i32_0 = arith.constant 0 : i32
    %c0_i32_1 = arith.constant 0 : i32
    return %c0_i32, %c0_i32_0 : i32, i32
  }
  func.func @transform_3(%arg0: i32) -> (i32, i32) {
    %c0_i32 = arith.constant 0 : i32
    %c0_i32_0 = arith.constant 0 : i32
    %c0_i32_1 = arith.constant 0 : i32
    return %c0_i32, %c0_i32_0 : i32, i32
  }
  func.func @transform_4(%arg0: i32) -> (i32, i32) {
    %c0_i32 = arith.constant 0 : i32
    %c0_i32_0 = arith.constant 0 : i32
    %c0_i32_1 = arith.constant 0 : i32
    return %c0_i32, %c0_i32_0 : i32, i32
  }
  func.func @transform_5(%arg0: i32) -> (i32, i32) {
    %c0_i32 = arith.constant 0 : i32
    %c0_i32_0 = arith.constant 0 : i32
    %c0_i32_1 = arith.constant 0 : i32
    return %c0_i32, %c0_i32_0 : i32, i32
  }
  func.func @transform_6(%arg0: i32) -> (i32, i32) {
    %c0_i32 = arith.constant 0 : i32
    %c0_i32_0 = arith.constant 0 : i32
    %c0_i32_1 = arith.constant 0 : i32
    return %c0_i32, %c0_i32_0 : i32, i32
  }
  func.func @transform_7(%arg0: i32) -> (i32, i32) {
    %c0_i32 = arith.constant 0 : i32
    %c0_i32_0 = arith.constant 0 : i32
    return %arg0, %c0_i32 : i32, i32
  }
}

</mosaic_0001>

<bundles_post_ra>
// kernel: tpu_custom_call.1
= control target key start
LH: loop header
LB: loop body
LE: loop exit
PB: predicated region body
PF: predicated region fallthrough
CT: control target
= control target key end

     0   :  { %12 = vsyncpa [#allocation3], 0  ;;  %s1271_s0 = inlined_call_operand.hbm [shape: bf16[32,32], index: 0, kind: input, shape index: {}]   ;;  %s1272_s1 = inlined_call_operand.hbm [shape: bf16[32,128], index: 1, kind: input, shape index: {}]   ;;  %s1273_s2 = inlined_call_operand.vmem [shape: f32[1,128], index: 2, kind: input, shape index: {}]   ;;  %s1274_s3 = inlined_call_operand.vmem [shape: f32[1,128], index: 3, kind: input, shape index: {}]   ;;  %s1275_s4 = inlined_call_operand.vmem [shape: f32[1,128], index: 4, kind: input, shape index: {}]   ;;  %s1276_s5 = inlined_call_operand.hbm [shape: bf16[128,128], index: 5, kind: input, shape index: {}]   ;;  %s1277_s6 = inlined_call_operand.vmem [shape: f32[1,128], index: 6, kind: input, shape index: {}]   ;;  %s1278_s7 = inlined_call_operand.hbm [shape: f32[32,128], index: 7, kind: output, shape index: {}]  }
   0x1   :  { %14 = vsyncpa [#allocation3 + $0x1], 0 }
   0x2   :  { %15 = vsyncpa [#allocation6], 0 }
   0x3   :  { %16 = vsyncpa [#allocation4], 0 }
   0x4   :  { %18 = vsyncpa [#allocation4 + $0x1], 0  ;;  %s1015_s24 = smov 0   ;;  %s1017_s25 = smov 0  }
   0x5   :  { %s1019_s26 = smov 0   ;;  %s1021_s27 = smov 0  }
   0x6 LB: > { %s1036_s28 = sadd.s32 4294967295, %s963_s27   ;;  %s647_s29 = sadd.s32 4294967294, %s963_s27   ;;  %s963_s27 = sphi %s1021_s27, %s1300_s27   ;;  %s959_s26 = sphi %s1019_s26, %s1299_s26   ;;  %s955_s25 = sphi %s1017_s25, %s1298_s25   ;;  %s951_s24 = sphi %s1015_s24, %s1297_s24  }
   0x7   : > { %p44_p0 = scmp.ne.s32.totalorder %s955_s25, %s951_s24  ;;  %p1279_p1 = scmp.eq.s32.totalorder %s1036_s28, 0 }
   0x8   : > { %p200_p3 = scmp.eq.s32.totalorder %s647_s29, 1  ;;  %p648_p5 = scmp.ge.s32.totalorder %s963_s27, 1 }
   0x9   : > { %p1045_p4 = por %p1279_p1, %p44_p0  ;;  %p207_p7 = scmp.lt.s32.totalorder %s963_s27, 3 }
   0xa   : > { %p1050_p6 = por %p200_p3, %p44_p0  ;;  %s965_s10 = smov [#allocation5]  }
   0xb   : > { %s1283_s30 = scalar_select %p1045_p4, 1, 0 }
   0xc   : > { %s1284_s8 = scalar_select %p1050_p6, 1, 0 }
   0xd   : > { %p1055_p8 = pnand %p648_p5, %p207_p7  ;;  %s219_s11 = sshll.u32 %s965_s10, 4  ;;  %s1059_s11 = int_to_ptr.vmem [resolvable:$true] %s219_s11 }
   0xe   : > { %s966_s13 = smov [#allocation7]   ;;  %s807_s17 = scalar_lea.hbm %s1272_s1, 256 }
   0xf   : > { %p735_p9 = pneg %p1055_p8  ;;  %s241_s14 = sshll.u32 %s966_s13, 4  ;;  %s1070_s14 = int_to_ptr.vmem [resolvable:$true] %s241_s14 }
  0x10   : > { %p808_p12 = scmp.ne.s32.totalorder %s1272_s1, %s807_s17  ;;  %p814_p5 = scmp.lt.u32.totalorder %s807_s17, %s1272_s1 }
  0x11   : > { %p1066_p11 = pnand %p735_p9, %p1279_p1 }
  0x13   : > { %p809_p13 = pneg %p1066_p11 }
  0x15   : > { %p810_p0 = pnand %p809_p13, %p808_p12 }
  0x17   : > { %p811_p3 = pneg %p810_p0 }
  0x19   : > { %p816_p7 = pnand %p814_p5, %p811_p3 }
  0x1b   : > { %819 = shalt.err (!%p816_p7)
}
  0x1c   : > { %s820_s22 = scalar_lea.vmem %s1059_s11, 256  ;;  %p828_p2 = scmp.lt.s32.totalorder %s1059_s11, %s1059_s11 }
  0x1d   : > { %p821_p9 = scmp.ne.s32.totalorder %s1059_s11, %s820_s22  ;;  %p829_p12 = scmp.lt.s32.totalorder %s820_s22, %s820_s22 }
  0x1f   : > { %p823_p10 = pnand %p821_p9, %p809_p13  ;;  %p830_p0 = por %p829_p12, %p828_p2 }
  0x21   : > { %p824_p1 = pneg %p823_p10 }
  0x23   : > { %p831_p6 = pnand %p830_p0, %p824_p1 }
  0x25   : > { %834 = shalt.err (!%p831_p6)
}
  0x26   : > { %s1280_s23 = smov 64   ;;  %s968_s29 = smov 4  }
  0x27   : > { %738 = dma.hbm_to_vmem [thread:$0]  (!%p1066_p11), %s1272_s1, 256, %s1059_s11, [#allocation6], %s1280_s23, %s1280_s23, %s968_s29  }
  0x28   : > { %s835_s17 = scalar_lea.hbm %s1276_s5, 1024 }
  0x29   : > { %p836_p1 = scmp.ne.s32.totalorder %s1276_s5, %s835_s17  ;;  %p842_p10 = scmp.lt.u32.totalorder %s835_s17, %s1276_s5 }
  0x2b   : > { %p838_p2 = pnand %p836_p1, %p809_p13 }
  0x2d   : > { %p839_p6 = pneg %p838_p2 }
  0x2f   : > { %p844_p3 = pnand %p842_p10, %p839_p6 }
  0x31   : > { %847 = shalt.err (!%p844_p3)
}
  0x32   : > { %s848_s11 = scalar_lea.vmem %s1070_s14, 1024  ;;  %p856_p12 = scmp.lt.s32.totalorder %s1070_s14, %s1070_s14 }
  0x33   : > { %p849_p5 = scmp.ne.s32.totalorder %s1070_s14, %s848_s11  ;;  %p857_p0 = scmp.lt.s32.totalorder %s848_s11, %s848_s11 }
  0x35   : > { %p851_p7 = pnand %p849_p5, %p809_p13  ;;  %p858_p1 = por %p857_p0, %p856_p12 }
  0x37   : > { %p852_p9 = pneg %p851_p7 }
  0x39   : > { %p859_p2 = pnand %p858_p1, %p852_p9 }
  0x3b   : > { %862 = shalt.err (!%p859_p2)
}
  0x3c   : > { %741 = dma.hbm_to_vmem [thread:$0]  (!%p1066_p11), %s1276_s5, 1024, %s1070_s14, [#allocation6], %s1280_s23, %s1280_s23, %s968_s29  }
  0x3d   : > { %s1131_s12 = sadd.s32 1, %s963_s27   ;;  %s31_s13 = sadd.s32 1, %s959_s26 }
  0x3e   : > { %s28_s15 = ssub.s32 %s963_s27, %s1131_s12  ;;  %p38_p13 = scmp.ne.s32.totalorder %s959_s26, %s955_s25 }
  0x3f   : > { %p29_p6 = scmp.eq.s32.totalorder %s28_s15, 0  ;;  %p39_p10 = scmp.eq.s32.totalorder %s963_s27, 0 }
  0x40   : > { %p1287_p3 = scmp.eq.s32.totalorder %s1036_s28, 1  ;;  %p752_p7 = scmp.lt.s32.totalorder %s963_s27, 2 }
  0x41   : > { %s1147_s17 = scalar_select %p29_p6, %s959_s26, %s31_s13  }
  0x42   : > { %p1141_p5 = por %p1287_p3, %p38_p13  ;;  %p40_p9 = por %p39_p10, %p38_p13 }
  0x43   : > { %s258_s18 = sand.u32 1, %s959_s26   ;;  %s681_s14 = sshll.u32 %s963_s27, 7 }
  0x44   : > { %s1288_s16 = scalar_select %p1141_p5, 1, 0 }
  0x45   : > { %s652_s19 = sshll.u32 %s258_s18, 3  ;;  %s1154_s11 = scalar_lea.hbm %s1271_s0, %s681_s14 }
  0x46   : > { %s262_s22 = scalar_lea.vmem [#allocation2], %s652_s19  ;;  %p1158_p11 = pnand %p752_p7, %p40_p9 }
  0x47   : > { %s269_s10 = sshll.u32 %s262_s22, 4  ;;  %s1162_s15 = scalar_lea.sflag [#allocation3], %s258_s18  ;;  %s1156_s10 = int_to_ptr.vmem [resolvable:$true] %s269_s10 }
  0x48   : > { %s863_s23 = scalar_lea.hbm %s1154_s11, 128  ;;  %p865_p0 = pneg %p1158_p11 }
  0x49   : > { %p864_p12 = scmp.ne.s32.totalorder %s1154_s11, %s863_s23  ;;  %s868_s20 = scalar_lea.hbm %s1271_s0, 256 }
  0x4a   : > { %p869_p13 = scmp.lt.u32.totalorder %s1154_s11, %s1271_s0  ;;  %p870_p6 = scmp.lt.u32.totalorder %s868_s20, %s863_s23 }
  0x4b   : > { %p866_p1 = pnand %p865_p0, %p864_p12  ;;  %p872_p3 = scmp.lt.u32.totalorder %s863_s23, %s1154_s11 }
  0x4c   : > { %p871_p10 = por %p870_p6, %p869_p13 }
  0x4d   : > { %p867_p2 = pneg %p866_p1 }
  0x4e   : > { %p873_p7 = por %p872_p3, %p871_p10 }
  0x50   : > { %p874_p9 = pnand %p873_p7, %p867_p2 }
  0x52   : > { %877 = shalt.err (!%p874_p9)
}
  0x53   : > { %s878_s18 = scalar_lea.vmem %s1156_s10, 128  ;;  %s969_s19 = smov [#allocation2]  }
  0x54   : > { %p879_p12 = scmp.ne.s32.totalorder %s1156_s10, %s878_s18  ;;  %s883_s14 = sshll.u32 %s969_s19, 4  ;;  %s884_s14 = int_to_ptr.vmem [resolvable:$false] %s883_s14 }
  0x55   : > { %s885_s21 = scalar_lea.vmem %s884_s14, 256  ;;  %p886_p4 = scmp.lt.s32.totalorder %s1156_s10, %s884_s14 }
  0x56   : > { %p881_p1 = pnand %p879_p12, %p865_p0  ;;  %p887_p13 = scmp.lt.s32.totalorder %s885_s21, %s878_s18 }
  0x58   : > { %p882_p5 = pneg %p881_p1  ;;  %p888_p6 = por %p887_p13, %p886_p4 }
  0x5a   : > { %p889_p10 = pnand %p888_p6, %p882_p5 }
  0x5c   : > { %892 = shalt.err (!%p889_p10)
}
  0x5d   : > { %s1290_s23 = smov 64   ;;  %281 = sbr.rel (%p1055_p8) target bundleno = 571 (0x23b), region = 48 }
  0x5e   : > { %745 = dma.hbm_to_vmem [thread:$0]  (!%p1158_p11), %s1154_s11, 128, %s1156_s10, %s1162_s15, %s1290_s23, %s1290_s23, %s968_s29  }
  0x5f   : > { %s1196_s20 = sand.u32 (!%p1055_p8), 1, %s955_s25   ;;  %p1291_p4 = scmp.ne.s32.totalorder (!%p1055_p8), %s1283_s30, 0 }
  0x60   : > { %s656_s22 = sshll.u32 (!%p1055_p8), %s1196_s20, 3  ;;  %s284_s18 = scalar_lea.sflag (!%p1055_p8), [#allocation3], %s1196_s20 }
  0x61   : > { %s287_s19 = scalar_lea.vmem (!%p1055_p8), [#allocation2], %s656_s22 }
  0x64   : > { %938 = dma.done.wait (%p1291_p4), %s284_s18, 128  }
  0x65   : > { %940 = vsyncadd (%p1291_p4), %s284_s18, 4294967168  ;;  %p1292_p5 = scmp.eq.s32.totalorder %s1036_s28, 0 }
  0x67   : > { %942 = dma.done.wait (%p1292_p5), [#allocation6], 1280   ;;  %p1293_p11 = pmov %p1292_p5 }
  0x68   : > { %v970_v0 = vmov 0.0   ;;  %vm971_vm0 = vmmov 0   ;;  %v796_v1 = vld [vmem:[#allocation5] sm:$0xff]   ;;  %v797_v2 = vld [vmem:[#allocation5 + $0x8] sm:$0xff]   ;;  %v799_v3 = vld [vmem:[#allocation7] sm:$0xff]   ;;  %vm359_vm1 = vcmask 261120  }
  0x69   : > { %944 = vsyncadd (%p1293_p11), [#allocation6], 4294966016  ;;  %695 = vmatprep.subr.bf16.mxu0 %v970_v0  ;;  %699 = vmatprep.mubr.msk.bf16.mxu0 %vm971_vm0, %v970_v0  ;;  %v798_v4 = vld [vmem:[%s287_s19] sm:$0xff]   ;;  %v801_v6 = vld [vmem:[#allocation7 + $0x10] sm:$0xff]   ;;  %s659_s15 = sshll.u32 %s1196_s20, 4  ;;  %s682_s18 = sshll.u32 %s1036_s28, 8 }
  0x6a   : > { %703 = vmatprep.subr.bf16.mxu1 %v970_v0  ;;  %719 = vmatprep.mubr.msk.bf16.mxu1 %vm971_vm0, %v970_v0  ;;  %v800_v5 = vld [vmem:[#allocation7 + $0x8] sm:$0xff]   ;;  %v802_v7 = vld [vmem:[#allocation7 + $0x18] sm:$0xff]   ;;  %v803_v8 = vld [vmem:[#allocation7 + $0x20] sm:$0xff]   ;;  %s325_s23 = scalar_lea.vmem [#allocation8], %s659_s15  ;;  %s1227_s9 = scalar_lea.hbm %s1278_s7, %s682_s18 }
  0x6b   : > { %696 = vmatpush3.bf16.msra.mxu0 %v796_v1  ;;  %704 = vmatpush3.bf16.msra.mxu1 %v799_v3  ;;  %v804_v9 = vld [vmem:[#allocation7 + $0x28] sm:$0xff]   ;;  %v805_v10 = vld [vmem:[#allocation7 + $0x30] sm:$0xff]   ;;  %v806_v11 = vld [vmem:[#allocation7 + $0x38] sm:$0xff]   ;;  %s555_s22 = sshll.u32 %s325_s23, 4  ;;  %s542_s29 = scalar_lea.sflag [#allocation4], %s1196_s20  ;;  %s1222_s22 = int_to_ptr.vmem [resolvable:$true] %s555_s22 }
  0x6c   : > { %697 = vmatprep.subr.bf16.mxu0 %v970_v0  ;;  %705 = vmatprep.subr.bf16.mxu1 %v970_v0  ;;  %v660_v12 = vld [vmem:[%s1273_s2] ss:$0 sm:$0xff]  ;;  %s893_s28 = scalar_lea.vmem %s1222_s22, 256  ;;  %p1294_p0 = scmp.ne.s32.totalorder %s1288_s16, 0 }
  0x6d   : > { %v665_v16 = vld [vmem:[%s1274_s3] ss:$0 sm:$0xff]  ;;  %p894_p8 = scmp.ne.s32.totalorder %s1222_s22, %s893_s28  ;;  %s972_s11 = smov [#allocation8]  }
  0x6e   : > { %v666_v21 = vld [vmem:[%s1275_s4] ss:$0 sm:$0xff]  ;;  %s897_s10 = sshll.u32 %s972_s11, 4  ;;  %s898_s10 = int_to_ptr.vmem [resolvable:$false] %s897_s10 }
  0x6f   : > { %698 = vmatpush3.bf16.msra.mxu0 %v797_v2  ;;  %706 = vmatpush3.bf16.msra.mxu1 %v800_v5  ;;  %v667_v30 = vld [vmem:[%s1277_s6] ss:$0 sm:$0xff]  ;;  %p895_p2 = pnand %p894_p8, %p1294_p0  ;;  %s899_s13 = scalar_lea.vmem %s898_s10, 512 }
  0x70   : > { %707 = vmatprep.subr.bf16.mxu1 %v970_v0  ;;  %p900_p7 = scmp.lt.s32.totalorder %s1222_s22, %s898_s10  ;;  %p901_p9 = scmp.lt.s32.totalorder %s899_s13, %s893_s28 }
  0x71   : > { %p896_p3 = pneg %p895_p2 }
  0x72   : > { %700 = vmatmul.mubr.msk.bf16.vlgmr.msra.gmra.mrb[0].mxu0 %vm359_vm1, %v798_v4  ;;  %p902_p12 = por %p901_p9, %p900_p7 }
  0x73   : > { %708 = vmatpush3.bf16.msra.mxu1 %v801_v6 }
  0x74   : > { %709 = vmatprep.subr.bf16.mxu1 %v970_v0  ;;  %p903_p1 = pnand %p902_p12, %p896_p3 }
  0x77   : > { %710 = vmatpush3.bf16.msra.mxu1 %v802_v7 }
  0x78   : > { %711 = vmatprep.subr.bf16.mxu1 %v970_v0 }
  0x7b   : > { %712 = vmatpush3.bf16.msra.mxu1 %v803_v8 }
  0x7c   : > { %713 = vmatprep.subr.bf16.mxu1 %v970_v0 }
  0x7f   : > { %714 = vmatpush3.bf16.msra.mxu1 %v804_v9 }
  0x80   : > { %715 = vmatprep.subr.bf16.mxu1 %v970_v0 }
  0x83   : > { %716 = vmatpush3.bf16.msra.mxu1 %v805_v10 }
  0x84   : > { %717 = vmatprep.subr.bf16.mxu1 %v970_v0 }
  0x87   : > { %718 = vmatpush3.bf16.msra.mxu1 %v806_v11 }
 0x145   : > { %v397_v13 = vpop.f32.mrb[0].mxu0 }
 0x146   : > { %v398_v14 = vadd.f32 %v660_v12, %v397_v13  ;;  %v701_v15 = vpop.f32.mrb[1].mxu0 }
 0x147   : > { %v400_v17 = vpop.f32.mrb[2].mxu0 }
 0x148   : > { %v404_v18 = vmax.f32 %v398_v14, 0.0  ;;  %v401_v19 = vadd.f32 %v660_v12, %v400_v17  ;;  %v702_v20 = vpop.f32.mrb[3].mxu0 }
 0x14a   : > { %v413_v22 = vmul.f32 %v665_v16, %v404_v18  ;;  %v405_v23 = vmax.f32 %v401_v19, 0.0 }
 0x14c   : > { %v422_v24 = vadd.f32 %v666_v21, %v413_v22  ;;  %v414_v25 = vmul.f32 %v665_v16, %v405_v23 }
 0x14e   : > { %v423_v26 = vadd.f32 %v666_v21, %v414_v25  ;;  %v424_v27 = vmax.f32 %v422_v24, 0.0 }
 0x150   : > { %v425_v28 = vmax.f32 %v423_v26, 0.0 }
 0x152   : > { %v426_v29 = vpack.c.bf16 %v425_v28, %v424_v27 }
 0x154   : > { %720 = vmatmul.mubr.bf16.vlgmr.msra.gmra.mrb[0].mxu1 %v426_v29 }
 0x227   : > { %v532_v31 = vpop.f32.mrb[0].mxu1 }
 0x228   : > { %v533_v32 = vadd.f32 %v667_v30, %v532_v31  ;;  %v721_v33 = vpop.f32.mrb[1].mxu1 }
 0x229   : > { %v535_v34 = vpop.f32.mrb[2].mxu1 }
 0x22a   : > { %539 = vst [vmem:[%s325_s23] sm:$0xff] %v533_v32  ;;  %v536_v35 = vadd.f32 %v667_v30, %v535_v34  ;;  %v722_v36 = vpop.f32.mrb[3].mxu1 }
 0x22c   : > { %540 = vst [vmem:[%s325_s23 + $0x8] sm:$0xff] %v536_v35 }
 0x22d   : > { %906 = shalt.err (!%p903_p1)
}
 0x22e   : > { %s907_s15 = scalar_lea.hbm %s1227_s9, 256  ;;  %s911_s23 = scalar_lea.hbm %s1278_s7, 512 }
 0x22f   : > { %p908_p13 = scmp.ne.s32.totalorder %s1227_s9, %s907_s15  ;;  %p912_p4 = scmp.lt.u32.totalorder %s1227_s9, %s1278_s7 }
 0x230   : > { %p913_p5 = scmp.lt.u32.totalorder %s911_s23, %s907_s15  ;;  %p915_p8 = scmp.lt.u32.totalorder %s907_s15, %s1227_s9 }
 0x231   : > { %p909_p6 = pnand %p908_p13, %p1294_p0 }
 0x232   : > { %p914_p11 = por %p913_p5, %p912_p4 }
 0x233   : > { %p910_p10 = pneg %p909_p6 }
 0x234   : > { %p916_p2 = por %p915_p8, %p914_p11 }
 0x236   : > { %p917_p3 = pnand %p916_p2, %p910_p10 }
 0x238   : > { %920 = shalt.err (!%p917_p3)
}
 0x239   : > { %s973_s30 = smov 128   ;;  %s974_s28 = smov 8  }
 0x23a   : > { %733 = dma.vmem_to_hbm [thread:$0]  (%p1294_p0), %s1222_s22, 256, %s1227_s9, %s542_s29, %s973_s30, %s973_s30, %s974_s28  }
 0x23b PF: > { %s570_s11 = sand.u32 1, %s951_s24   ;;  %p1295_p7 = scmp.ne.s32.totalorder %s1284_s8, 0 }
 0x23c   : > { %p1296_p9 = scmp.ge.s32.totalorder %s963_s27, 2  ;;  %s571_s10 = scalar_lea.sflag [#allocation4], %s570_s11 }
 0x23e   : > { %p747_p12 = pnand %p1296_p9, %p1295_p7 }
 0x240   : > { %946 = dma.done.wait (!%p747_p12), %s571_s10, 256  }
 0x241   : > { %948 = vsyncadd (!%p747_p12), %s571_s10, 4294967040  ;;  %p21_p1 = scmp.ge.s32.totalorder %s1131_s12, 4   ;;  %s1297_s24 = smov %s955_s25 }
 0x242   : > { %s1298_s25 = smov %s959_s26  ;;  %s1299_s26 = smov %s1147_s17 }
 0x243   : > { %s1300_s27 = smov %s1131_s12  ;;  %23 = sbr.rel (!%p21_p1) target bundleno = 6 (0x6), region = 101 }
 0x24a   :  { %576 = vsyncpa [#allocation3], 1 }
 0x24b   :  { %578 = vsyncpa [#allocation3 + $0x1], 1 }
 0x24c   :  { %579 = vsyncpa [#allocation6], 1 }
 0x24d   :  { %580 = vsyncpa [#allocation4], 1 }
 0x24e   :  { %582 = vsyncpa [#allocation4 + $0x1], 1 }

</bundles_post_ra>
